<compile_context>
chip_gen: v7x
topology: tpu7x:2x2x1
jax: 0.10.0
libtpu: 0.0.40
codegen_flags: <defaults>
</compile_context>

<pallas_src>
import functools

import jax
import jax.numpy as jnp
from jax import lax
from jax.experimental import pallas as pl
from jax.experimental.pallas import tpu as pltpu


def _ca_kernel(x_ref, w1_ref, w2_ref, o_ref, acc_sum, acc_max, *,
               s_total, s_blk, acc_w, ragged):
    # x_ref:   VMEM (C, s_blk)       one batch element's channels x spatial block
    # w1_ref:  VMEM (C8, C)  f32     fc1 weight (1x1x1 conv, C -> C//8), bias-free
    # w2_ref:  VMEM (C, C8)  f32     fc2 weight (1x1x1 conv, C//8 -> C), bias-free
    # o_ref:   VMEM (C, 1)           sigmoid(fc2(relu(fc1(avg))) + fc2(relu(fc1(max))))
    # acc_sum: VMEM (C, acc_w) f32   running wide channel-sum accumulator
    # acc_max: VMEM (C, acc_w) f32   running wide channel-max accumulator
    s_idx = pl.program_id(1)
    last = pl.num_programs(1) - 1

    @pl.when(s_idx == 0)
    def _():
        acc_sum[...] = jnp.zeros_like(acc_sum)
        acc_max[...] = jnp.full_like(acc_max, -jnp.inf)

    def fold(v, combine):
        # (C, s_blk) -> (C, acc_w) via 2:1 halving. All slices are static and
        # 128-lane aligned (s_blk is a power-of-two multiple of acc_w), so this is
        # pure VPU work: no XLU cross-lane ops, no dynamic lane addressing.
        while v.shape[1] > acc_w:
            half = v.shape[1] // 2
            v = combine(v[:, :half], v[:, half:])
        return v

    def accumulate(valid_lanes):
        xb = x_ref[...].astype(jnp.float32)                      # (C, s_blk)
        if valid_lanes is None:                                  # steady state: no mask
            xs, xm = xb, xb
        else:                                                    # ragged tail only
            pos = lax.broadcasted_iota(jnp.int32, xb.shape, 1)
            ok = pos < valid_lanes
            xs = jnp.where(ok, xb, 0.0)
            xm = jnp.where(ok, xb, -jnp.inf)
        acc_sum[...] = acc_sum[...] + fold(xs, jnp.add)
        acc_max[...] = jnp.maximum(acc_max[...], fold(xm, jnp.maximum))

    if ragged:
        # Only the final (partial) block pays the mask work.
        @pl.when(s_idx != last)
        def _():
            accumulate(None)

        @pl.when(s_idx == last)
        def _():
            accumulate(s_total % s_blk)
    else:
        accumulate(None)

    @pl.when(s_idx == last)
    def _():
        # Single cross-lane (XLU) reduce per batch element, then the tiny FCs.
        sum_c = jnp.sum(acc_sum[...], axis=1, keepdims=True)     # (C, 1)
        max_c = jnp.max(acc_max[...], axis=1, keepdims=True)     # (C, 1)
        pooled = jnp.concatenate([sum_c * (1.0 / float(s_total)), max_c], axis=1)  # (C, 2)
        hidden = jnp.dot(w1_ref[...], pooled, preferred_element_type=jnp.float32)  # (C8, 2)
        hidden = jnp.maximum(hidden, 0.0)                        # ReLU
        out2 = jnp.dot(w2_ref[...], hidden, preferred_element_type=jnp.float32)    # (C, 2)
        o_ref[...] = jax.nn.sigmoid(out2[:, 0:1] + out2[:, 1:2]).astype(o_ref.dtype)


def _pick_s_blk(S, C, itemsize, s_blk, block_target_bytes):
    """Lane-dense spatial block size: a power-of-two multiple of 128 (so the in-kernel
    2:1 fold uses only static 128-aligned slices), sized toward `block_target_bytes`
    of x per grid step, preferring a block that divides S (mask-free steady state)."""
    if S < 128:
        return S                                     # single full-extent block
    if s_blk is not None:                            # user override, snapped/clamped
        s_blk = max(128, min(int(s_blk), S))
        p = 128
        while p * 2 <= s_blk:
            p *= 2
        return p
    target_lanes = max(128, block_target_bytes // (C * itemsize))
    max_lanes = min(target_lanes, S)
    p = 128
    while p * 2 <= max_lanes:
        p *= 2
    # Prefer a divisor of S (no ragged tail) as long as we shrink at most 2x.
    if S % p != 0 and p > 128 and S % (p // 2) == 0:
        p //= 2
    return p


def channel_attention_3d(x, fc1_weight, fc2_weight, *, s_blk=None,
                         block_target_bytes=4 * 1024 * 1024):
    """x: (N, C, D, H, W); fc1_weight: (C//8, C, 1, 1, 1); fc2_weight: (C, C//8, 1, 1, 1).

    Returns sigmoid(fc2(relu(fc1(avgpool(x)))) + fc2(relu(fc1(maxpool(x))))),
    shape (N, C, 1, 1, 1), matching channel_attention_3D.forward (bias-free convs)."""
    N, C, D, H, W = x.shape
    S = D * H * W
    C8 = fc1_weight.shape[0]
    itemsize = jnp.dtype(x.dtype).itemsize

    w1 = fc1_weight.reshape(C8, C).astype(jnp.float32)
    w2 = fc2_weight.reshape(C, C8).astype(jnp.float32)
    x2 = x.reshape(N, C, S)                                      # spatial axis lane-dense

    s_blk = _pick_s_blk(S, C, itemsize, s_blk, block_target_bytes)
    n_s = pl.cdiv(S, s_blk)
    ragged = (S % s_blk) != 0
    acc_w = min(s_blk, 128)

    # Explicit VMEM budget: double-buffered x block + weights + output + accumulators,
    # plus fold temporaries / compiler scratch headroom.  Floor 32 MiB (v5e's 16 MiB
    # default scoped limit would otherwise reject the bigger block), cap 48 MiB so we
    # keep headroom on v7x's 64 MiB physical VMEM.
    vmem_bytes = (2 * C * s_blk * itemsize            # x block, double-buffered
                  + 2 * 2 * C8 * C * 4                # w1 + w2, double-buffered (f32)
                  + 2 * C * itemsize                  # output block, double-buffered
                  + 2 * C * acc_w * 4                 # sum/max accumulators
                  + 3 * C * s_blk * 4                 # fold temporaries (f32)
                  + (4 << 20))                        # compiler scratch headroom
    vmem_limit = int(min(max(vmem_bytes, 32 << 20), 48 << 20))

    kernel = functools.partial(_ca_kernel, s_total=S, s_blk=s_blk,
                               acc_w=acc_w, ragged=ragged)

    out = pl.pallas_call(
        kernel,
        out_shape=jax.ShapeDtypeStruct((N, C, 1), x.dtype),
        grid=(N, n_s),
        in_specs=[
            pl.BlockSpec((None, C, s_blk), lambda n, s: (n, 0, s)),   # x (lane-dense)
            pl.BlockSpec((C8, C), lambda n, s: (0, 0)),               # fc1 weight
            pl.BlockSpec((C, C8), lambda n, s: (0, 0)),               # fc2 weight
        ],
        out_specs=pl.BlockSpec((None, C, 1), lambda n, s: (n, 0, 0)),
        scratch_shapes=[
            pltpu.VMEM((C, acc_w), jnp.float32),   # wide running channel sums
            pltpu.VMEM((C, acc_w), jnp.float32),   # wide running channel maxes
        ],
        compiler_params=pltpu.CompilerParams(
            dimension_semantics=("parallel", "arbitrary"),
            vmem_limit_bytes=vmem_limit,
        ),
    )(x2, w1, w2)
    return out.reshape(N, C, 1, 1, 1)


def _reference(x, fc1_weight, fc2_weight):
    # pure-JAX reference of the PyTorch forward
    C8 = fc1_weight.shape[0]
    C = fc2_weight.shape[0]
    w1 = fc1_weight.reshape(C8, C)
    w2 = fc2_weight.reshape(C, C8)
    avg = jnp.mean(x, axis=(2, 3, 4))                            # (N, C)
    mx = jnp.max(x, axis=(2, 3, 4))                              # (N, C)

    def fc(p):
        return jnp.maximum(p @ w1.T, 0.0) @ w2.T

    out = jax.nn.sigmoid(fc(avg) + fc(mx))                       # (N, C)
    return out.reshape(out.shape[0], out.shape[1], 1, 1, 1)


if __name__ == "__main__":
    key = jax.random.PRNGKey(0)
    kx, k1, k2 = jax.random.split(key, 3)

    # Small shapes consistent with channel_attention_3D (in_planes must be >= 8).
    N, C, D, H, W = 2, 16, 4, 8, 16          # S = D*H*W = 512
    C8 = C // 8
    x = jax.random.normal(kx, (N, C, D, H, W), dtype=jnp.float32)
    fc1_w = jax.random.normal(k1, (C8, C, 1, 1, 1), dtype=jnp.float32) * 0.2
    fc2_w = jax.random.normal(k2, (C, C8, 1, 1, 1), dtype=jnp.float32) * 0.2

    ref = _reference(x, fc1_w, fc2_w)

    # 1) Default block: whole spatial axis in one lane-dense block; exercises the
    #    VPU-only 2:1 fold (512 -> 256 -> 128 lanes) and the epilogue.
    out = jax.block_until_ready(channel_attention_3d(x, fc1_w, fc2_w))
    assert out.shape == (N, C, 1, 1, 1), out.shape
    assert jnp.allclose(out, ref, atol=1e-5, rtol=1e-5), float(jnp.max(jnp.abs(out - ref)))

    # 2) Small explicit block: 4 spatial grid steps; exercises the resident
    #    accumulators and pl.when init/finalize.
    out2 = jax.block_until_ready(channel_attention_3d(x, fc1_w, fc2_w, s_blk=128))
    assert jnp.allclose(out2, ref, atol=1e-5, rtol=1e-5), float(jnp.max(jnp.abs(out2 - ref)))

    # 3) Ragged spatial extent: masking runs only on the last grid step.
    x3 = jax.random.normal(kx, (1, C, 3, 5, 13), dtype=jnp.float32)   # S = 195
    ref3 = _reference(x3, fc1_w, fc2_w)
    out3 = jax.block_until_ready(channel_attention_3d(x3, fc1_w, fc2_w, s_blk=128))
    assert jnp.allclose(out3, ref3, atol=1e-5, rtol=1e-5), float(jnp.max(jnp.abs(out3 - ref3)))

    # 4) Tiny spatial extent (< 128 lanes): single full-extent block.
    x4 = jax.random.normal(kx, (2, C, 2, 4, 8), dtype=jnp.float32)    # S = 64
    ref4 = _reference(x4, fc1_w, fc2_w)
    out4 = jax.block_until_ready(channel_attention_3d(x4, fc1_w, fc2_w))
    assert jnp.allclose(out4, ref4, atol=1e-5, rtol=1e-5), float(jnp.max(jnp.abs(out4 - ref4)))

    print("KERNEL_OK")
</pallas_src>

<mosaic_0001>
module attributes {stable_mosaic.version = 11 : i64} {
  func.func @_ca_kernel(%arg0: i32, %arg1: i32, %arg2: memref<1x16x512xf32, #tpu.memory_space<vmem>>, %arg3: memref<2x16xf32, #tpu.memory_space<vmem>>, %arg4: memref<16x2xf32, #tpu.memory_space<vmem>>, %arg5: memref<1x16x1xf32, #tpu.memory_space<vmem>>, %arg6: memref<16x128xf32, #tpu.memory_space<vmem>>, %arg7: memref<16x128xf32, #tpu.memory_space<vmem>>) attributes {dimension_semantics = [#tpu.dimension_semantics<parallel>, #tpu.dimension_semantics<arbitrary>], iteration_bounds = array<i64: 2, 1>, scalar_prefetch = 0 : i64, scratch_operands = 2 : i64, tpu.core_type = #tpu.core_type<tc>, window_params = [{transform_indices = @transform_0, window_bounds = array<i64: 1, 16, 512>}, {pipeline_mode = #tpu.pipeline_mode<synchronous>, transform_indices = @transform_1, window_bounds = array<i64: 2, 16>}, {pipeline_mode = #tpu.pipeline_mode<synchronous>, transform_indices = @transform_2, window_bounds = array<i64: 16, 2>}, {transform_indices = @transform_3, window_bounds = array<i64: 1, 16, 1>}]} {
    %c0_i32 = arith.constant 0 : i32
    %0 = arith.cmpi eq, %arg1, %c0_i32 : i32
    %1 = arith.extui %0 : i1 to i32
    %c0_i32_0 = arith.constant 0 : i32
    %2 = arith.cmpi ne, %1, %c0_i32_0 : i32
    scf.if %2 {
      %cst = arith.constant 0.000000e+00 : f32
      %26 = vector.broadcast %cst : f32 to vector<16x128xf32>
      %c0_13 = arith.constant 0 : index
      %c0_14 = arith.constant 0 : index
      %27 = vector.load %arg6[%c0_13, %c0_14] : memref<16x128xf32, #tpu.memory_space<vmem>>, vector<16x128xf32>
      tpu.vector_store %arg6[%c0_13, %c0_14], %26 {strides = array<i32>} : memref<16x128xf32, #tpu.memory_space<vmem>>, vector<16x128xf32>,
      %cst_15 = arith.constant 0xFF800000 : f32
      %28 = vector.broadcast %cst_15 : f32 to vector<16x128xf32>
      %c0_16 = arith.constant 0 : index
      %c0_17 = arith.constant 0 : index
      %29 = vector.load %arg7[%c0_16, %c0_17] : memref<16x128xf32, #tpu.memory_space<vmem>>, vector<16x128xf32>
      tpu.vector_store %arg7[%c0_16, %c0_17], %28 {strides = array<i32>} : memref<16x128xf32, #tpu.memory_space<vmem>>, vector<16x128xf32>,
    } else {
    }
    %c0 = arith.constant 0 : index
    %c0_1 = arith.constant 0 : index
    %c0_2 = arith.constant 0 : index
    %3 = vector.load %arg2[%c0, %c0_1, %c0_2] : memref<1x16x512xf32, #tpu.memory_space<vmem>>, vector<1x16x512xf32>
    %4 = vector.shape_cast %3 : vector<1x16x512xf32> to vector<16x512xf32>
    %c0_3 = arith.constant 0 : index
    %c0_4 = arith.constant 0 : index
    %5 = vector.load %arg6[%c0_3, %c0_4] : memref<16x128xf32, #tpu.memory_space<vmem>>, vector<16x128xf32>
    %6 = vector.extract_strided_slice %4 {offsets = [0, 0], sizes = [16, 256], strides = [1, 1]} : vector<16x512xf32> to vector<16x256xf32>
    %7 = vector.extract_strided_slice %4 {offsets = [0, 256], sizes = [16, 256], strides = [1, 1]} : vector<16x512xf32> to vector<16x256xf32>
    %8 = arith.addf %6, %7 : vector<16x256xf32>
    %9 = vector.extract_strided_slice %8 {offsets = [0, 0], sizes = [16, 128], strides = [1, 1]} : vector<16x256xf32> to vector<16x128xf32>
    %10 = vector.extract_strided_slice %8 {offsets = [0, 128], sizes = [16, 128], strides = [1, 1]} : vector<16x256xf32> to vector<16x128xf32>
    %11 = arith.addf %9, %10 : vector<16x128xf32>
    %12 = arith.addf %5, %11 : vector<16x128xf32>
    %c0_5 = arith.constant 0 : index
    %c0_6 = arith.constant 0 : index
    %13 = vector.load %arg6[%c0_5, %c0_6] : memref<16x128xf32, #tpu.memory_space<vmem>>, vector<16x128xf32>
    tpu.vector_store %arg6[%c0_5, %c0_6], %12 {strides = array<i32>} : memref<16x128xf32, #tpu.memory_space<vmem>>, vector<16x128xf32>,
    %c0_7 = arith.constant 0 : index
    %c0_8 = arith.constant 0 : index
    %14 = vector.load %arg7[%c0_7, %c0_8] : memref<16x128xf32, #tpu.memory_space<vmem>>, vector<16x128xf32>
    %15 = vector.extract_strided_slice %4 {offsets = [0, 0], sizes = [16, 256], strides = [1, 1]} : vector<16x512xf32> to vector<16x256xf32>
    %16 = vector.extract_strided_slice %4 {offsets = [0, 256], sizes = [16, 256], strides = [1, 1]} : vector<16x512xf32> to vector<16x256xf32>
    %17 = arith.maximumf %15, %16 : vector<16x256xf32>
    %18 = vector.extract_strided_slice %17 {offsets = [0, 0], sizes = [16, 128], strides = [1, 1]} : vector<16x256xf32> to vector<16x128xf32>
    %19 = vector.extract_strided_slice %17 {offsets = [0, 128], sizes = [16, 128], strides = [1, 1]} : vector<16x256xf32> to vector<16x128xf32>
    %20 = arith.maximumf %18, %19 : vector<16x128xf32>
    %21 = arith.maximumf %14, %20 : vector<16x128xf32>
    %c0_9 = arith.constant 0 : index
    %c0_10 = arith.constant 0 : index
    %22 = vector.load %arg7[%c0_9, %c0_10] : memref<16x128xf32, #tpu.memory_space<vmem>>, vector<16x128xf32>
    tpu.vector_store %arg7[%c0_9, %c0_10], %21 {strides = array<i32>} : memref<16x128xf32, #tpu.memory_space<vmem>>, vector<16x128xf32>,
    %c0_i32_11 = arith.constant 0 : i32
    %23 = arith.cmpi eq, %arg1, %c0_i32_11 : i32
    %24 = arith.extui %23 : i1 to i32
    %c0_i32_12 = arith.constant 0 : i32
    %25 = arith.cmpi ne, %24, %c0_i32_12 : i32
    scf.if %25 {
      %c0_13 = arith.constant 0 : index
      %c0_14 = arith.constant 0 : index
      %26 = vector.load %arg6[%c0_13, %c0_14] : memref<16x128xf32, #tpu.memory_space<vmem>>, vector<16x128xf32>
      %cst = arith.constant dense<0.000000e+00> : vector<16xf32>
      %27 = vector.multi_reduction <add>, %26, %cst [1] : vector<16x128xf32> to vector<16xf32>
      %28 = vector.shape_cast %27 : vector<16xf32> to vector<16x1xf32>
      %c0_15 = arith.constant 0 : index
      %c0_16 = arith.constant 0 : index
      %29 = vector.load %arg7[%c0_15, %c0_16] : memref<16x128xf32, #tpu.memory_space<vmem>>, vector<16x128xf32>
      %cst_17 = arith.constant dense<0xFF800000> : vector<16xf32>
      %30 = vector.multi_reduction <maximumf>, %29, %cst_17 [1] : vector<16x128xf32> to vector<16xf32>
      %31 = vector.shape_cast %30 : vector<16xf32> to vector<16x1xf32>
      %cst_18 = arith.constant 0.001953125 : f32
      %32 = vector.broadcast %cst_18 : f32 to vector<16x1xf32>
      %33 = arith.mulf %28, %32 : vector<16x1xf32>
      %34 = tpu.concatenate %33, %31 in 1 : vector<16x1xf32>, vector<16x1xf32> -> vector<16x2xf32>
      %c0_19 = arith.constant 0 : index
      %c0_20 = arith.constant 0 : index
      %35 = vector.load %arg3[%c0_19, %c0_20] : memref<2x16xf32, #tpu.memory_space<vmem>>, vector<2x16xf32>
      %cst_21 = arith.constant dense<0.000000e+00> : vector<2x2xf32>
      %36 = tpu.matmul %35, %34, %cst_21 {dimension_numbers = #tpu.dot_dimension_numbers<[1], [0], [0], [1], [0, 0, 1, 1], [], []>} : vector<2x16xf32>, vector<16x2xf32>, vector<2x2xf32> -> vector<2x2xf32>
      %cst_22 = arith.constant 0.000000e+00 : f32
      %37 = vector.broadcast %cst_22 : f32 to vector<2x2xf32>
      %38 = arith.maximumf %36, %37 : vector<2x2xf32>
      %c0_23 = arith.constant 0 : index
      %c0_24 = arith.constant 0 : index
      %39 = vector.load %arg4[%c0_23, %c0_24] : memref<16x2xf32, #tpu.memory_space<vmem>>, vector<16x2xf32>
      %cst_25 = arith.constant dense<0.000000e+00> : vector<16x2xf32>
      %40 = tpu.matmul %39, %38, %cst_25 {dimension_numbers = #tpu.dot_dimension_numbers<[1], [0], [0], [1], [0, 0, 1, 1], [], []>} : vector<16x2xf32>, vector<2x2xf32>, vector<16x2xf32> -> vector<16x2xf32>
      %41 = vector.extract_strided_slice %40 {offsets = [0, 0], sizes = [16, 1], strides = [1, 1]} : vector<16x2xf32> to vector<16x1xf32>
      %42 = vector.extract_strided_slice %40 {offsets = [0, 1], sizes = [16, 1], strides = [1, 1]} : vector<16x2xf32> to vector<16x1xf32>
      %43 = arith.addf %41, %42 : vector<16x1xf32>
      %44 = arith.negf %43 : vector<16x1xf32>
      %45 = math.exp %44 : vector<16x1xf32>
      %cst_26 = arith.constant 1.000000e+00 : f32
      %46 = vector.broadcast %cst_26 : f32 to vector<16x1xf32>
      %47 = arith.addf %46, %45 : vector<16x1xf32>
      %48 = arith.divf %46, %47 : vector<16x1xf32>
      %c0_27 = arith.constant 0 : index
      %c0_28 = arith.constant 0 : index
      %c0_29 = arith.constant 0 : index
      %49 = vector.load %arg5[%c0_27, %c0_28, %c0_29] : memref<1x16x1xf32, #tpu.memory_space<vmem>>, vector<1x16x1xf32>
      %50 = vector.shape_cast %49 : vector<1x16x1xf32> to vector<16x1xf32>
      %51 = vector.shape_cast %48 : vector<16x1xf32> to vector<1x16x1xf32>
      tpu.vector_store %arg5[%c0_27, %c0_28, %c0_29], %51 {strides = array<i32>} : memref<1x16x1xf32, #tpu.memory_space<vmem>>, vector<1x16x1xf32>,
    } else {
    }
    return
  }
  func.func @transform_0(%arg0: i32, %arg1: i32) -> (i32, i32, i32) {
    %c0_i32 = arith.constant 0 : i32
    %c0_i32_0 = arith.constant 0 : i32
    return %arg0, %c0_i32, %arg1 : i32, i32, i32
  }
  func.func @transform_1(%arg0: i32, %arg1: i32) -> (i32, i32) {
    %c0_i32 = arith.constant 0 : i32
    %c0_i32_0 = arith.constant 0 : i32
    %c0_i32_1 = arith.constant 0 : i32
    return %c0_i32, %c0_i32_0 : i32, i32
  }
  func.func @transform_2(%arg0: i32, %arg1: i32) -> (i32, i32) {
    %c0_i32 = arith.constant 0 : i32
    %c0_i32_0 = arith.constant 0 : i32
    %c0_i32_1 = arith.constant 0 : i32
    return %c0_i32, %c0_i32_0 : i32, i32
  }
  func.func @transform_3(%arg0: i32, %arg1: i32) -> (i32, i32, i32) {
    %c0_i32 = arith.constant 0 : i32
    %c0_i32_0 = arith.constant 0 : i32
    %c0_i32_1 = arith.constant 0 : i32
    return %arg0, %c0_i32, %c0_i32_0 : i32, i32, i32
  }
}

</mosaic_0001>

<bundles_post_ra>
// kernel: tpu_custom_call.1
= control target key start
LH: loop header
LB: loop body
LE: loop exit
PB: predicated region body
PF: predicated region fallthrough
CT: control target
= control target key end

     0   :  { %8 = vsyncpa [#allocation5], 0  ;;  %s891_s0 = inlined_call_operand.hbm [shape: f32[2,16,512], index: 0, kind: input, shape index: {}]   ;;  %s892_s1 = inlined_call_operand.vmem [shape: f32[2,16], index: 1, kind: input, shape index: {}]   ;;  %s893_s2 = inlined_call_operand.vmem [shape: f32[16,2], index: 2, kind: input, shape index: {}]   ;;  %s894_s3 = inlined_call_operand.vmem [shape: f32[2,16,1], index: 3, kind: output, shape index: {}]  }
   0x1   :  { %10 = vsyncpa [#allocation5 + $0x1], 0  ;;  %s754_s12 = smov 0   ;;  %s756_s13 = smov 0  }
   0x2   :  { %s758_s14 = smov 0   ;;  %s760_s15 = smov 0  }
   0x3   :  { %s762_s16 = smov 0   ;;  %s764_s17 = smov 0  }
   0x4 LB: > { %s534_s18 = sadd.s32 4294967295, %s725_s17   ;;  %s28_s19 = sadd.s32 1, %s721_s16  ;;  %s725_s17 = sphi %s764_s17, %s16_s17   ;;  %s721_s16 = sphi %s762_s16, %s902_s16   ;;  %s717_s15 = sphi %s760_s15, %s901_s15   ;;  %s713_s14 = sphi %s758_s14, %s900_s14   ;;  %s709_s13 = sphi %s756_s13, %s899_s13   ;;  %s705_s12 = sphi %s754_s12, %s898_s12  }
   0x5   : > { %p30_p0 = scmp.ge.s32.totalorder %s28_s19, 2  ;;  %s37_s20 = sadd.s32 1, %s713_s14 }
   0x6   : > { %p44_p1 = scmp.ne.s32.totalorder %s713_s14, %s709_s13  ;;  %p45_p2 = scmp.eq.s32.totalorder %s725_s17, 0 }
   0x7   : > { %s904_s19 = smov (%p30_p0, %s28_s19), 0  ;;  %p50_p4 = scmp.ne.s32.totalorder %s709_s13, %s705_s12 }
   0x8   : > { %p790_p3 = por %p45_p2, %p44_p1  ;;  %s32_s22 = ssub.s32 %s721_s16, %s904_s19 }
   0x9   : > { %p51_p5 = scmp.eq.s32.totalorder %s534_s18, 0  ;;  %p35_p6 = scmp.eq.s32.totalorder %s32_s22, 0 }
   0xa   : > { %p582_p8 = scmp.lt.s32.totalorder %s725_s17, 2  ;;  %s148_s25 = sand.u32 1, %s713_s14  }
   0xb   : > { %p797_p7 = por %p51_p5, %p50_p4  ;;  %s553_s26 = sshll.u32 %s721_s16, 10 }
   0xc   : > { %s803_s24 = scalar_select %p35_p6, %s713_s14, %s37_s20  }
   0xd   : > { %s538_s27 = sshll.u32 %s148_s25, 6  ;;  %s810_s30 = scalar_lea.hbm %s891_s0, %s553_s26 }
   0xe   : > { %s152_s4 = scalar_lea.vmem [#allocation4], %s538_s27  ;;  %p814_p9 = pnand %p582_p8, %p790_p3 }
   0xf   : > { %s161_s5 = sshll.u32 %s152_s4, 4  ;;  %s820_s7 = scalar_lea.sflag [#allocation5], %s148_s25  ;;  %s818_s5 = int_to_ptr.vmem [resolvable:$true] %s161_s5 }
  0x10   : > { %s645_s8 = scalar_lea.hbm %s810_s30, 1024  ;;  %p647_p11 = pneg %p814_p9 }
  0x11   : > { %p646_p10 = scmp.ne.s32.totalorder %s810_s30, %s645_s8  ;;  %s650_s11 = scalar_lea.hbm %s891_s0, 2048 }
  0x12   : > { %p651_p0 = scmp.lt.u32.totalorder %s810_s30, %s891_s0  ;;  %p652_p1 = scmp.lt.u32.totalorder %s650_s11, %s645_s8 }
  0x13   : > { %p648_p12 = pnand %p647_p11, %p646_p10  ;;  %p654_p3 = scmp.lt.u32.totalorder %s645_s8, %s810_s30 }
  0x14   : > { %p653_p2 = por %p652_p1, %p651_p0 }
  0x15   : > { %p649_p13 = pneg %p648_p12 }
  0x16   : > { %p655_p4 = por %p654_p3, %p653_p2 }
  0x18   : > { %p656_p5 = pnand %p655_p4, %p649_p13 }
  0x1a   : > { %659 = shalt.err (!%p656_p5)
}
  0x1b   : > { %s660_s20 = scalar_lea.vmem %s818_s5, 1024  ;;  %s727_s21 = smov [#allocation4]  }
  0x1c   : > { %p661_p6 = scmp.ne.s32.totalorder %s818_s5, %s660_s20  ;;  %s665_s22 = sshll.u32 %s727_s21, 4  ;;  %s666_s22 = int_to_ptr.vmem [resolvable:$false] %s665_s22 }
  0x1d   : > { %s667_s25 = scalar_lea.vmem %s666_s22, 2048  ;;  %p668_p12 = scmp.lt.s32.totalorder %s818_s5, %s666_s22 }
  0x1e   : > { %p663_p8 = pnand %p661_p6, %p647_p11  ;;  %p669_p0 = scmp.lt.s32.totalorder %s667_s25, %s660_s20 }
  0x20   : > { %p664_p10 = pneg %p663_p8  ;;  %p670_p1 = por %p669_p0, %p668_p12 }
  0x22   : > { %p671_p2 = pnand %p670_p1, %p664_p10 }
  0x24   : > { %674 = shalt.err (!%p671_p2)
}
  0x25   : > { %s728_s26 = smov 512   ;;  %s729_s27 = smov 32  }
  0x26   : > { %581 = dma.hbm_to_vmem [thread:$0]  (!%p814_p9), %s810_s30, 1024, %s818_s5, %s820_s7, %s728_s26, %s728_s26, %s729_s27  }
  0x27   : > { %p541_p11 = scmp.ge.s32.totalorder %s725_s17, 1  ;;  %p169_p13 = scmp.lt.s32.totalorder %s725_s17, 3 }
  0x29   : > { %p170_p3 = pnand %p541_p11, %p169_p13 }
  0x2a   : > { %s175_s28 = sand.u32 (!%p170_p3), 1, %s709_s13  }
  0x2b   : > { %173 = sbr.rel (%p170_p3) target bundleno = 784 (0x310), region = 32  ;;  %s542_s29 = sshll.u32 (!%p170_p3), %s175_s28, 6 }
  0x2c   : > { %s176_s4 = scalar_lea.sflag (!%p170_p3), [#allocation5], %s175_s28  ;;  %s179_s8 = scalar_lea.vmem (!%p170_p3), [#allocation4], %s542_s29 }
  0x32   : > { %700 = dma.done.wait (%p797_p7), %s176_s4, 1024  }
  0x33   : > { %702 = vsyncadd (%p797_p7), %s176_s4, 4294966272  ;;  %v216_v0 = vld [vmem:[%s179_s8] sm:$0xff]  ;;  %v217_v1 = vld [vmem:[%s179_s8 + $0x8] sm:$0xff]  ;;  %v730_v20 = vmov 0.0|0.0   ;;  %vm731_vm0 = vmmov 0   ;;  %v732_v21 = vmov 0.0  }
  0x34   : > { %v218_v2 = vld [vmem:[%s179_s8 + $0x10] sm:$0xff]  ;;  %v219_v3 = vld [vmem:[%s179_s8 + $0x18] sm:$0xff]  ;;  %v220_v6 = vld [vmem:[%s179_s8 + $0x20] sm:$0xff]  ;;  %573 = vmatprep.subr.bf16.mxu0 %v730_v20  ;;  %565 = vmatprep.mubr.msk.f32.mxu0 %vm731_vm0, %v732_v21  ;;  %vm265_vm1 = vcmask 7168   ;;  %vm269_vm2 = vcmask 130048   ;;  %vm346_vm3 = vcmask 15360  }
  0x35   : > { %v226_v4 = vadd.f32 %v218_v2, %v216_v0  ;;  %v238_v5 = vmax.f32 %v216_v0, %v218_v2  ;;  %v221_v7 = vld [vmem:[%s179_s8 + $0x28] sm:$0xff]  ;;  %v227_v8 = vadd.f32 %v219_v3, %v217_v1  ;;  %v239_v9 = vmax.f32 %v217_v1, %v219_v3  ;;  %v222_v10 = vld [vmem:[%s179_s8 + $0x30] sm:$0xff]  ;;  %v223_v11 = vld [vmem:[%s179_s8 + $0x38] sm:$0xff]  ;;  %s733_s10 = smov 127   ;;  %p203_p7 = scmp.lt.s32.totalorder %s717_s15, 1 }
  0x36   : > { %v228_v12 = vadd.f32 %v222_v10, %v220_v6  ;;  %v229_v13 = vadd.f32 %v223_v11, %v221_v7  ;;  %v240_v14 = vmax.f32 %v220_v6, %v222_v10  ;;  %v241_v15 = vmax.f32 %v221_v7, %v223_v11  ;;  %v268_v31 = vld [vmem:[%s892_s1] sm:$0x3]  ;;  %v345_v36 = vld [vmem:[%s893_s2 + $0x8] sm:$0xff] }
  0x37   : > { %v230_v16 = vadd.f32 %v227_v8, %v226_v4  ;;  %v242_v17 = vmax.f32 %v238_v5, %v239_v9  ;;  %v344_v32 = vld [vmem:[%s893_s2] sm:$0xff]  ;;  %vm353_vm4 = vcmask 1041408   ;;  %s906_s15 = smov (!%p203_p7, %s717_s15), 1 }
  0x38   : > { %v231_v18 = vadd.f32 %v229_v13, %v228_v12  ;;  %v243_v19 = vmax.f32 %v240_v14, %v241_v15  ;;  %570 = vmatprep.mubr.msk.f32.mxu1 %vm346_vm3, %v344_v32  ;;  %s554_s11 = sshll.u32 %s906_s15, 4 }
  0x39   : > { %253 = vadd.xlane.f32.xlu0 %v230_v16  ;;  %259 = vmax.xlane.f32.xlu1 %v242_v17  ;;  %s207_s20 = scalar_lea.vmem %s894_s3, %s554_s11 }
  0x3d   : > { %255 = vadd.xlane.f32.xlu0 %v231_v18  ;;  %261 = vmax.xlane.f32.xlu1 %v243_v19 }
  0xc6   : > { %v254_v22 = vpop.xlane.xlu0 %253  ;;  %v260_v23 = vpop.xlane.xlu1 %259 }
  0xc7   : > { %v263_v24 = vmul.f32 0.001953125, %v254_v22 }
  0xc9   : > { %v266_v28 = vsel %vm265_vm1, %v263_v24, %v260_v23 }
  0xca   : > { %v256_v25 = vpop.xlane.xlu0 %255  ;;  %v262_v26 = vpop.xlane.xlu1 %261 }
  0xcb   : > { %v264_v27 = vmul.f32 0.001953125, %v256_v25 }
  0xcd   : > { %v267_v29 = vsel %vm265_vm1, %v264_v27, %v262_v26 }
  0xce   : > { %v574_v30 = vpack.c.bf16 %v267_v29, %v266_v28 }
  0xd0   : > { %575 = vmatpush3.bf16.msra.mxu0 %v574_v30 }
  0xd3   : > { %566 = vmatmul.mubr.msk.f32.vlgmr.msra.gmra.mrb[0].mxu0 %vm269_vm2, %v268_v31 }
 0x1a6   : > { %v339_v33 = vpop.f32.mrb[0].mxu0 }
 0x1a7   : > { %v343_v34 = vmax.f32 %v339_v33, 0.0  ;;  %v567_v35 = vpop.f32.mrb[1].mxu0 }
 0x1a9   : > { %568 = vmatprep.subr.msk.mxu1 %vm353_vm4, %v343_v34 }
 0x1aa   : > { %569 = vmatpush3.msk.msra.mxu1 %vm353_vm4, %v343_v34 }
 0x1ab   : > { %571 = vmatmul.mubr.msk.f32.vlgmr.msra.gmra.mrb[0].mxu1 %vm346_vm3, %v345_v36 }
 0x27e   : > { %v572_v37 = vpop.f32.mrb[0].mxu1 }
 0x27f   : > { %436 = vrot.lane.b32.xlu1 %v572_v37, %s733_s10  ;;  %v423_v38 = vpop.f32.mrb[1].mxu1 }
 0x280   : > { %434 = vrot.lane.b32.xlu0 %v423_v38, %s733_s10 }
 0x2f1   : > { %v437_v39 = vpop.permute.xlu1 %436 }
 0x2f2   : > { %v441_v40 = vadd.f32 %v572_v37, %v437_v39  ;;  %v435_v41 = vpop.permute.xlu0 %434 }
 0x2f3   : > { %v440_v42 = vadd.f32 %v435_v41, %v423_v38 }
 0x2f4   : > { %v550_v43 = vmul.f32 -1.442695, %v441_v40 }
 0x2f5   : > { %v549_v44 = vmul.f32 -1.442695, %v440_v42 }
 0x2f6   : > { %637 = vpow2.f32 %v550_v43 }
 0x2f7   : > { %639 = vpow2.f32 %v549_v44 }
 0x300   : > { %v638_v45 = vpop.eup %637 }
 0x301   : > { %v640_v46 = vpop.eup %639  ;;  %v449_v47 = vadd.f32 1.0, %v638_v45 }
 0x302   : > { %v448_v48 = vadd.f32 1.0, %v640_v46 }
 0x303   : > { %641 = vrcp.f32 %v449_v47 }
 0x304   : > { %643 = vrcp.f32 %v448_v48 }
 0x30d   : > { %v642_v49 = vpop.eup %641 }
 0x30e   : > { %v644_v50 = vpop.eup %643  ;;  %455 = vst.msk [vmem:[%s207_s20 + $0x8] sm:$0xff] %vm265_vm1, %v642_v49 }
 0x30f   : > { %454 = vst.msk [vmem:[%s207_s20] sm:$0xff] %vm265_vm1, %v644_v50 }
 0x310 PF: > { %s16_s17 = sadd.s32 1, %s725_s17   ;;  %s898_s12 = smov %s709_s13 }
 0x311   : > { %p13_p9 = scmp.ge.s32.totalorder %s16_s17, 4   ;;  %s899_s13 = smov %s713_s14 }
 0x312   : > { %s900_s14 = smov %s803_s24  ;;  %s901_s15 = smov %s721_s16 }
 0x313   : > { %s902_s16 = smov %s904_s19  ;;  %15 = sbr.rel (!%p13_p9) target bundleno = 4 (0x4), region = 80 }
 0x31a   :  { %477 = vsyncpa [#allocation5], 1 }
 0x31b   :  { %479 = vsyncpa [#allocation5 + $0x1], 1 }

</bundles_post_ra>
